<compile_context>
chip_gen: v5e
topology: v5e:2x2
jax: 0.10.0
libtpu: 0.0.40
codegen_flags: <defaults>
</compile_context>

<pallas_src>
import numpy as np
import jax
import jax.numpy as jnp
from jax.experimental import pallas as pl
from jax.experimental.pallas import tpu as pltpu


def get_padding(kernel_size: int, stride: int = 1, dilation: int = 1) -> int:
    return (stride - 1 + dilation * (kernel_size - 1)) // 2


def _binomial_coeffs(filt_size: int) -> np.ndarray:
    # coeffs of (0.5 + 0.5 x)^(filt_size - 1)  == np.poly1d((0.5, 0.5)) ** (filt_size-1)
    c = np.array([1.0], dtype=np.float64)
    for _ in range(filt_size - 1):
        c = np.convolve(c, np.array([0.5, 0.5], dtype=np.float64))
    return c.astype(np.float32)


def _reflect_index(i: int, n: int) -> int:
    # PyTorch-style 'reflect' (edge not repeated). Valid for -(n-1) <= i <= 2*(n-1).
    if i < 0:
        return -i
    if i >= n:
        return 2 * (n - 1) - i
    return i


def _build_operators(H: int, W: int, filt_size: int, stride: int, pad: int):
    """Row/col blur+subsample operators with reflect padding folded in.

    out = R @ x @ Cm^T  with  R: (Ho, H),  Cm: (Wo, W)  acting on UNPADDED x.
    """
    coeffs = _binomial_coeffs(filt_size)
    Ho = (H + 2 * pad - filt_size) // stride + 1
    Wo = (W + 2 * pad - filt_size) // stride + 1
    R = np.zeros((Ho, H), dtype=np.float32)
    Cm = np.zeros((Wo, W), dtype=np.float32)
    for o in range(Ho):
        for d in range(filt_size):
            R[o, _reflect_index(stride * o + d - pad, H)] += coeffs[d]
    for o in range(Wo):
        for d in range(filt_size):
            Cm[o, _reflect_index(stride * o + d - pad, W)] += coeffs[d]
    return R, Cm, Ho, Wo


# Conservative VMEM budget for the double-buffered input/output blocks.
# (Scoped VMEM default: 16 MiB on v5e, 32 MiB on v6e/v7x; we raise v5e to 32 MiB
#  via vmem_limit_bytes and keep the buffers comfortably under it.)
_VMEM_BUFFER_BUDGET = 20 * 1024 * 1024


def _choose_block(num_planes: int, in_bytes_per_plane: int, out_bytes_per_plane: int) -> int:
    per_plane = 2 * (in_bytes_per_plane + out_bytes_per_plane)  # double-buffered in + out
    bc = max(1, _VMEM_BUFFER_BUDGET // per_plane)
    bc = min(bc, num_planes)
    if num_planes >= 2:
        # keep at least 2 grid steps so v7x's two TensorCores both get work
        bc = min(bc, (num_planes + 1) // 2)
    # pick the largest divisor of num_planes <= bc (avoids partial edge blocks)
    for cand in range(bc, 0, -1):
        if num_planes % cand == 0:
            return cand
    return 1


def _blurpool_kernel(r_ref, ct_ref, x_ref, o_ref):
    # r_ref : (Ho, H)    row blur+subsample operator (reflect folded in)
    # ct_ref: (W, Wo)    column operator, pre-transposed
    # x_ref : (Bc, H, W) Bc unpadded channel planes
    # o_ref : (Bc, Ho, Wo)
    r = r_ref[...]
    ct = ct_ref[...]
    bc = x_ref.shape[0]
    for b in range(bc):  # static unroll over the plane batch
        t = jnp.dot(r, x_ref[b], preferred_element_type=jnp.float32)       # (Ho, W)
        o_ref[b] = jnp.dot(t, ct, preferred_element_type=jnp.float32).astype(o_ref.dtype)


def blur_pool_2d(x: jax.Array, filt_size: int = 3, stride: int = 2) -> jax.Array:
    """BlurPool2d forward. x: (N, C, H, W). Returns (N, C, Ho, Wo) float32."""
    assert filt_size > 1
    N, C, H, W = x.shape
    pad = get_padding(filt_size, stride, dilation=1)
    # reflect padding (and the folded operators) require pad <= dim - 1
    assert pad <= H - 1 and pad <= W - 1, "spatial dims too small for reflect pad"

    R_np, Cm_np, Ho, Wo = _build_operators(H, W, filt_size, stride, pad)
    R = jnp.asarray(R_np)            # (Ho, H)
    CmT = jnp.asarray(Cm_np.T)       # (W, Wo)

    if x.dtype != jnp.float32:
        x = x.astype(jnp.float32)

    planes = N * C
    x_planes = x.reshape(planes, H, W)          # free reshape, no pad copy

    Bc = _choose_block(planes, H * W * 4, Ho * Wo * 4)
    grid = planes // Bc

    out_planes = pl.pallas_call(
        _blurpool_kernel,
        out_shape=jax.ShapeDtypeStruct((planes, Ho, Wo), jnp.float32),
        grid=(grid,),
        in_specs=[
            pl.BlockSpec((Ho, H), lambda i: (0, 0)),        # R   (shared, not re-DMA'd)
            pl.BlockSpec((W, Wo), lambda i: (0, 0)),        # C^T (shared, not re-DMA'd)
            pl.BlockSpec((Bc, H, W), lambda i: (i, 0, 0)),  # Bc planes per step
        ],
        out_specs=pl.BlockSpec((Bc, Ho, Wo), lambda i: (i, 0, 0)),
        compiler_params=pltpu.CompilerParams(
            dimension_semantics=("parallel",),
            vmem_limit_bytes=32 * 1024 * 1024,
        ),
    )(R, CmT, x_planes)

    return out_planes.reshape(N, C, Ho, Wo)


def _reference(x: jax.Array, filt_size: int = 3, stride: int = 2) -> jax.Array:
    """Pure-JAX reference matching F.conv2d(F.pad(x, reflect), filt, stride, groups=C)."""
    N, C, H, W = x.shape
    pad = get_padding(filt_size, stride, dilation=1)
    x_pad = jnp.pad(x, ((0, 0), (0, 0), (pad, pad), (pad, pad)), mode="reflect")
    coeffs = jnp.asarray(_binomial_coeffs(filt_size))
    filt = coeffs[:, None] * coeffs[None, :]                              # (k, k)
    w = jnp.tile(filt[None, None, :, :], (C, 1, 1, 1))                    # (C, 1, k, k)
    return jax.lax.conv_general_dilated(
        x_pad, w, window_strides=(stride, stride), padding="VALID",
        feature_group_count=C, dimension_numbers=("NCHW", "OIHW", "NCHW"))


if __name__ == "__main__":
    key = jax.random.PRNGKey(0)
    N, C, H, W = 2, 4, 16, 16
    x = jax.random.normal(key, (N, C, H, W), dtype=jnp.float32)

    out = blur_pool_2d(x, filt_size=3, stride=2)
    out = jax.block_until_ready(out)

    ref = jax.block_until_ready(_reference(x, filt_size=3, stride=2))
    assert out.shape == ref.shape == (N, C, 8, 8), (out.shape, ref.shape)
    np.testing.assert_allclose(np.asarray(out), np.asarray(ref), rtol=1e-4, atol=1e-4)

    print("KERNEL_OK")
</pallas_src>

<mosaic_0001>
module attributes {stable_mosaic.version = 11 : i64} {
  func.func @_blurpool_kernel(%arg0: i32, %arg1: memref<8x16xf32, #tpu.memory_space<vmem>>, %arg2: memref<16x8xf32, #tpu.memory_space<vmem>>, %arg3: memref<4x16x16xf32, #tpu.memory_space<vmem>>, %arg4: memref<4x8x8xf32, #tpu.memory_space<vmem>>) attributes {dimension_semantics = [#tpu.dimension_semantics<parallel>], iteration_bounds = array<i64: 2>, scalar_prefetch = 0 : i64, scratch_operands = 0 : i64, tpu.core_type = #tpu.core_type<tc>, window_params = [{pipeline_mode = #tpu.pipeline_mode<synchronous>, transform_indices = @transform_0, window_bounds = array<i64: 8, 16>}, {pipeline_mode = #tpu.pipeline_mode<synchronous>, transform_indices = @transform_1, window_bounds = array<i64: 16, 8>}, {transform_indices = @transform_2, window_bounds = array<i64: 4, 16, 16>}, {transform_indices = @transform_3, window_bounds = array<i64: 4, 8, 8>}]} {
    %c0 = arith.constant 0 : index
    %c0_0 = arith.constant 0 : index
    %0 = vector.load %arg1[%c0, %c0_0] : memref<8x16xf32, #tpu.memory_space<vmem>>, vector<8x16xf32>
    %c0_1 = arith.constant 0 : index
    %c0_2 = arith.constant 0 : index
    %1 = vector.load %arg2[%c0_1, %c0_2] : memref<16x8xf32, #tpu.memory_space<vmem>>, vector<16x8xf32>
    %c0_3 = arith.constant 0 : index
    %c0_4 = arith.constant 0 : index
    %c0_5 = arith.constant 0 : index
    %2 = vector.load %arg3[%c0_3, %c0_4, %c0_5] : memref<4x16x16xf32, #tpu.memory_space<vmem>>, vector<1x16x16xf32>
    %3 = vector.shape_cast %2 : vector<1x16x16xf32> to vector<16x16xf32>
    %cst = arith.constant dense<0.000000e+00> : vector<8x16xf32>
    %4 = tpu.matmul %0, %3, %cst {dimension_numbers = #tpu.dot_dimension_numbers<[1], [0], [0], [1], [0, 0, 1, 1], [], []>} : vector<8x16xf32>, vector<16x16xf32>, vector<8x16xf32> -> vector<8x16xf32>
    %cst_6 = arith.constant dense<0.000000e+00> : vector<8x8xf32>
    %5 = tpu.matmul %4, %1, %cst_6 {dimension_numbers = #tpu.dot_dimension_numbers<[1], [0], [0], [1], [0, 0, 1, 1], [], []>} : vector<8x16xf32>, vector<16x8xf32>, vector<8x8xf32> -> vector<8x8xf32>
    %c0_7 = arith.constant 0 : index
    %c0_8 = arith.constant 0 : index
    %c0_9 = arith.constant 0 : index
    %6 = vector.load %arg4[%c0_7, %c0_8, %c0_9] : memref<4x8x8xf32, #tpu.memory_space<vmem>>, vector<1x8x8xf32>
    %7 = vector.shape_cast %6 : vector<1x8x8xf32> to vector<8x8xf32>
    %8 = vector.shape_cast %5 : vector<8x8xf32> to vector<1x8x8xf32>
    tpu.vector_store %arg4[%c0_7, %c0_8, %c0_9], %8 {strides = array<i32>} : memref<4x8x8xf32, #tpu.memory_space<vmem>>, vector<1x8x8xf32>,
    %c1 = arith.constant 1 : index
    %c0_10 = arith.constant 0 : index
    %c0_11 = arith.constant 0 : index
    %9 = vector.load %arg3[%c1, %c0_10, %c0_11] : memref<4x16x16xf32, #tpu.memory_space<vmem>>, vector<1x16x16xf32>
    %10 = vector.shape_cast %9 : vector<1x16x16xf32> to vector<16x16xf32>
    %cst_12 = arith.constant dense<0.000000e+00> : vector<8x16xf32>
    %11 = tpu.matmul %0, %10, %cst_12 {dimension_numbers = #tpu.dot_dimension_numbers<[1], [0], [0], [1], [0, 0, 1, 1], [], []>} : vector<8x16xf32>, vector<16x16xf32>, vector<8x16xf32> -> vector<8x16xf32>
    %cst_13 = arith.constant dense<0.000000e+00> : vector<8x8xf32>
    %12 = tpu.matmul %11, %1, %cst_13 {dimension_numbers = #tpu.dot_dimension_numbers<[1], [0], [0], [1], [0, 0, 1, 1], [], []>} : vector<8x16xf32>, vector<16x8xf32>, vector<8x8xf32> -> vector<8x8xf32>
    %c1_14 = arith.constant 1 : index
    %c0_15 = arith.constant 0 : index
    %c0_16 = arith.constant 0 : index
    %13 = vector.load %arg4[%c1_14, %c0_15, %c0_16] : memref<4x8x8xf32, #tpu.memory_space<vmem>>, vector<1x8x8xf32>
    %14 = vector.shape_cast %13 : vector<1x8x8xf32> to vector<8x8xf32>
    %15 = vector.shape_cast %12 : vector<8x8xf32> to vector<1x8x8xf32>
    tpu.vector_store %arg4[%c1_14, %c0_15, %c0_16], %15 {strides = array<i32>} : memref<4x8x8xf32, #tpu.memory_space<vmem>>, vector<1x8x8xf32>,
    %c2 = arith.constant 2 : index
    %c0_17 = arith.constant 0 : index
    %c0_18 = arith.constant 0 : index
    %16 = vector.load %arg3[%c2, %c0_17, %c0_18] : memref<4x16x16xf32, #tpu.memory_space<vmem>>, vector<1x16x16xf32>
    %17 = vector.shape_cast %16 : vector<1x16x16xf32> to vector<16x16xf32>
    %cst_19 = arith.constant dense<0.000000e+00> : vector<8x16xf32>
    %18 = tpu.matmul %0, %17, %cst_19 {dimension_numbers = #tpu.dot_dimension_numbers<[1], [0], [0], [1], [0, 0, 1, 1], [], []>} : vector<8x16xf32>, vector<16x16xf32>, vector<8x16xf32> -> vector<8x16xf32>
    %cst_20 = arith.constant dense<0.000000e+00> : vector<8x8xf32>
    %19 = tpu.matmul %18, %1, %cst_20 {dimension_numbers = #tpu.dot_dimension_numbers<[1], [0], [0], [1], [0, 0, 1, 1], [], []>} : vector<8x16xf32>, vector<16x8xf32>, vector<8x8xf32> -> vector<8x8xf32>
    %c2_21 = arith.constant 2 : index
    %c0_22 = arith.constant 0 : index
    %c0_23 = arith.constant 0 : index
    %20 = vector.load %arg4[%c2_21, %c0_22, %c0_23] : memref<4x8x8xf32, #tpu.memory_space<vmem>>, vector<1x8x8xf32>
    %21 = vector.shape_cast %20 : vector<1x8x8xf32> to vector<8x8xf32>
    %22 = vector.shape_cast %19 : vector<8x8xf32> to vector<1x8x8xf32>
    tpu.vector_store %arg4[%c2_21, %c0_22, %c0_23], %22 {strides = array<i32>} : memref<4x8x8xf32, #tpu.memory_space<vmem>>, vector<1x8x8xf32>,
    %c3 = arith.constant 3 : index
    %c0_24 = arith.constant 0 : index
    %c0_25 = arith.constant 0 : index
    %23 = vector.load %arg3[%c3, %c0_24, %c0_25] : memref<4x16x16xf32, #tpu.memory_space<vmem>>, vector<1x16x16xf32>
    %24 = vector.shape_cast %23 : vector<1x16x16xf32> to vector<16x16xf32>
    %cst_26 = arith.constant dense<0.000000e+00> : vector<8x16xf32>
    %25 = tpu.matmul %0, %24, %cst_26 {dimension_numbers = #tpu.dot_dimension_numbers<[1], [0], [0], [1], [0, 0, 1, 1], [], []>} : vector<8x16xf32>, vector<16x16xf32>, vector<8x16xf32> -> vector<8x16xf32>
    %cst_27 = arith.constant dense<0.000000e+00> : vector<8x8xf32>
    %26 = tpu.matmul %25, %1, %cst_27 {dimension_numbers = #tpu.dot_dimension_numbers<[1], [0], [0], [1], [0, 0, 1, 1], [], []>} : vector<8x16xf32>, vector<16x8xf32>, vector<8x8xf32> -> vector<8x8xf32>
    %c3_28 = arith.constant 3 : index
    %c0_29 = arith.constant 0 : index
    %c0_30 = arith.constant 0 : index
    %27 = vector.load %arg4[%c3_28, %c0_29, %c0_30] : memref<4x8x8xf32, #tpu.memory_space<vmem>>, vector<1x8x8xf32>
    %28 = vector.shape_cast %27 : vector<1x8x8xf32> to vector<8x8xf32>
    %29 = vector.shape_cast %26 : vector<8x8xf32> to vector<1x8x8xf32>
    tpu.vector_store %arg4[%c3_28, %c0_29, %c0_30], %29 {strides = array<i32>} : memref<4x8x8xf32, #tpu.memory_space<vmem>>, vector<1x8x8xf32>,
    return
  }
  func.func @transform_0(%arg0: i32) -> (i32, i32) {
    %c0_i32 = arith.constant 0 : i32
    %c0_i32_0 = arith.constant 0 : i32
    %c0_i32_1 = arith.constant 0 : i32
    return %c0_i32, %c0_i32_0 : i32, i32
  }
  func.func @transform_1(%arg0: i32) -> (i32, i32) {
    %c0_i32 = arith.constant 0 : i32
    %c0_i32_0 = arith.constant 0 : i32
    %c0_i32_1 = arith.constant 0 : i32
    return %c0_i32, %c0_i32_0 : i32, i32
  }
  func.func @transform_2(%arg0: i32) -> (i32, i32, i32) {
    %c0_i32 = arith.constant 0 : i32
    %c0_i32_0 = arith.constant 0 : i32
    %c0_i32_1 = arith.constant 0 : i32
    return %arg0, %c0_i32, %c0_i32_0 : i32, i32, i32
  }
  func.func @transform_3(%arg0: i32) -> (i32, i32, i32) {
    %c0_i32 = arith.constant 0 : i32
    %c0_i32_0 = arith.constant 0 : i32
    %c0_i32_1 = arith.constant 0 : i32
    return %arg0, %c0_i32, %c0_i32_0 : i32, i32, i32
  }
}

</mosaic_0001>

<bundles_post_ra>
// kernel: tpu_custom_call.1
= control target key start
LH: loop header
LB: loop body
LE: loop exit
PB: predicated region body
PF: predicated region fallthrough
CT: control target
= control target key end

     0   :  { %8 = vsyncpa [#allocation3], 0  ;;  %s833_s0 = inlined_call_operand.vmem [shape: f32[8,16], index: 0, kind: input, shape index: {}]   ;;  %s834_s1 = inlined_call_operand.vmem [shape: f32[16,8], index: 1, kind: input, shape index: {}]   ;;  %s835_s2 = inlined_call_operand.hbm [shape: f32[8,16,16], index: 2, kind: input, shape index: {}]   ;;  %s836_s3 = inlined_call_operand.hbm [shape: f32[8,8,8], index: 3, kind: output, shape index: {}]  }
   0x1   :  { %10 = vsyncpa [#allocation3 + $0x1], 0 }
   0x2   :  { %11 = vsyncpa [#allocation4], 0 }
   0x3   :  { %13 = vsyncpa [#allocation4 + $0x1], 0  ;;  %s688_s12 = smov 0   ;;  %s690_s13 = smov 0  }
   0x4   :  { %s692_s14 = smov 0   ;;  %s694_s15 = smov 0  }
   0x5 LB: > { %s709_s16 = sadd.s32 4294967295, %s662_s15   ;;  %s481_s17 = sadd.s32 4294967294, %s662_s15   ;;  %s662_s15 = sphi %s694_s15, %s846_s15   ;;  %s658_s14 = sphi %s692_s14, %s845_s14   ;;  %s654_s13 = sphi %s690_s13, %s844_s13   ;;  %s650_s12 = sphi %s688_s12, %s843_s12  }
   0x6   : > { %s713_s18 = sadd.s32 1, %s662_s15   ;;  %s68_s19 = sadd.s32 1, %s658_s14 }
   0x7   : > { %s65_s20 = ssub.s32 %s662_s15, %s713_s18  ;;  %p75_p0 = scmp.ne.s32.totalorder %s658_s14, %s654_s13 }
   0x8   : > { %p66_p1 = scmp.eq.s32.totalorder %s65_s20, 0  ;;  %p76_p2 = scmp.eq.s32.totalorder %s662_s15, 0 }
   0x9   : > { %p81_p3 = scmp.ne.s32.totalorder %s654_s13, %s650_s12  ;;  %p82_p4 = scmp.eq.s32.totalorder %s709_s16, 0 }
   0xa   : > { %s725_s21 = scalar_select %p66_p1, %s658_s14, %s68_s19  }
   0xb   : > { %p727_p5 = por %p76_p2, %p75_p0  ;;  %p731_p6 = por %p82_p4, %p81_p3 }
   0xc   : > { %p105_p7 = scmp.eq.s32.totalorder %s709_s16, 1  ;;  %p111_p8 = scmp.eq.s32.totalorder %s481_s17, 1 }
   0xd   : > { %p528_p10 = scmp.lt.s32.totalorder %s662_s15, 2  ;;  %s137_s26 = sand.u32 1, %s658_s14  }
   0xe   : > { %p738_p11 = por %p105_p7, %p75_p0  ;;  %p742_p12 = por %p111_p8, %p81_p3 }
   0xf   : > { %s514_s27 = sshll.u32 %s662_s15, 6  ;;  %s484_s28 = sshll.u32 %s137_s26, 6 }
  0x10   : > { %s147_s4 = scalar_lea.hbm %s835_s2, %s514_s27  ;;  %s141_s6 = scalar_lea.vmem [#allocation2], %s484_s28 }
  0x11   : > { %s148_s5 = sshll.u32 %s147_s4, 4  ;;  %s150_s7 = sshll.u32 %s141_s6, 4  ;;  %s149_s5 = int_to_ptr.hbm [resolvable:$true] %s148_s5  ;;  %s151_s7 = int_to_ptr.vmem [resolvable:$true] %s150_s7 }
  0x12   : > { %p753_p13 = pnand %p528_p10, %p727_p5  ;;  %p488_p0 = scmp.ge.s32.totalorder %s662_s15, 1 }
  0x13   : > { %p158_p1 = scmp.lt.s32.totalorder %s662_s15, 3  ;;  %s138_s9 = scalar_lea.sflag [#allocation3], %s137_s26 }
  0x14   : > { %s566_s10 = sshra.s32 %s149_s5, 4  ;;  %p570_p3 = pneg %p753_p13  ;;  %s567_s10 = int_to_ptr.hbm [resolvable:$true] %s566_s10 }
  0x15   : > { %s568_s11 = scalar_lea.hbm %s567_s10, 64  ;;  %s573_s20 = scalar_lea.hbm %s835_s2, 128 }
  0x16   : > { %p569_p2 = scmp.ne.s32.totalorder %s567_s10, %s568_s11  ;;  %p574_p5 = scmp.lt.s32.totalorder %s567_s10, %s835_s2 }
  0x17   : > { %p575_p8 = scmp.lt.s32.totalorder %s573_s20, %s568_s11 }
  0x18   : > { %p571_p4 = pnand %p570_p3, %p569_p2 }
  0x19   : > { %p576_p10 = por %p575_p8, %p574_p5 }
  0x1a   : > { %p572_p7 = pneg %p571_p4 }
  0x1c   : > { %p577_p9 = pnand %p576_p10, %p572_p7 }
  0x1e   : > { %580 = shalt.err (!%p577_p9)
}
  0x1f   : > { %s664_s26 = smov 128   ;;  %s665_s28 = smov 8  }
  0x20   : > { %523 = dma.hbm_to_vmem [thread:$0]  (!%p753_p13), %s149_s5, 1024, %s151_s7, %s138_s9, %s664_s26, %s664_s26, %s665_s28  }
  0x21   : > { %p159_p2 = pnand %p488_p0, %p158_p1 }
  0x22   : > { %s774_s29 = sand.u32 (!%p159_p2), 1, %s654_s13  }
  0x23   : > { %162 = sbr.rel (%p159_p2) target bundleno = 321 (0x141), region = 32  ;;  %s489_s30 = sshll.u32 (!%p159_p2), %s774_s29, 6 }
  0x24   : > { %s165_s4 = scalar_lea.sflag (!%p159_p2), [#allocation3], %s774_s29  ;;  %s168_s6 = scalar_lea.vmem (!%p159_p2), [#allocation2], %s489_s30 }
  0x28   : > { %641 = dma.done.wait (%p731_p6), %s165_s4, 1024  }
  0x29   : > { %643 = vsyncadd (%p731_p6), %s165_s4, 4294966272  ;;  %v494_v0 = vld [vmem:[%s168_s6 + $0x18] sm:$0xff]  ;;  %v493_v1 = vld [vmem:[%s168_s6 + $0x10] sm:$0xff]  ;;  %vm199_vm0 = vcmask 130048   ;;  %s490_s11 = sshll.u32 %s774_s29, 5  ;;  %vm246_vm1 = vcmask 64512  }
  0x2a   : > { %265 = vmatpush.msra.mxu2 %v494_v0  ;;  %v194_v2 = vld [vmem:[%s833_s0] sm:$0xff]  ;;  %v198_v3 = vld [vmem:[%s168_s6 + $0x8] sm:$0xff]  ;;  %v504_v4 = vld [vmem:[%s168_s6 + $0x38] sm:$0xff]  ;;  %s191_s17 = scalar_lea.vmem [#allocation5], %s490_s11  ;;  %s515_s19 = sshll.u32 %s709_s16, 5 }
  0x2b   : > { %217 = vmatpush.msra.mxu0 %v198_v3  ;;  %v197_v5 = vld [vmem:[%s168_s6] sm:$0xff]  ;;  %v499_v6 = vld [vmem:[%s168_s6 + $0x28] sm:$0xff]  ;;  %v503_v8 = vld [vmem:[%s168_s6 + $0x30] sm:$0xff]  ;;  %s404_s27 = scalar_lea.hbm %s836_s3, %s515_s19  ;;  %s405_s26 = sshll.u32 %s191_s17, 4  ;;  %s406_s26 = int_to_ptr.vmem [resolvable:$true] %s405_s26 }
  0x2c   : > { %266 = vmatpush.msra.mxu2 %v493_v1  ;;  %v196_v7 = vld [vmem:[%s834_s1 + $0x8] sm:$0xff]  ;;  %v498_v9 = vld [vmem:[%s168_s6 + $0x20] sm:$0xff]  ;;  %s407_s28 = sshll.u32 %s404_s27, 4  ;;  %s393_s30 = scalar_lea.sflag [#allocation4], %s774_s29  ;;  %s408_s28 = int_to_ptr.hbm [resolvable:$true] %s407_s28 }
  0x2d   : > { %495 = vmatmul.msk.f32.vlgmr.msra.gmra.mxu2 %vm199_vm0, %v194_v2  ;;  %218 = vmatpush.msra.mxu0 %v197_v5  ;;  %v195_v10 = vld [vmem:[%s834_s1] sm:$0xff]  ;;  %s610_s4 = sshra.s32 %s408_s28, 4  ;;  %s616_s7 = scalar_lea.hbm %s836_s3, 64  ;;  %s611_s4 = int_to_ptr.hbm [resolvable:$true] %s610_s4 }
  0x2e   : > { %361 = vmatpush.msrb.mxu2 %v504_v4  ;;  %491 = vmatmul.msk.f32.vlgmr.msra.gmra.mxu0 %vm199_vm0, %v194_v2  ;;  %s612_s6 = scalar_lea.hbm %s611_s4, 32  ;;  %p617_p0 = scmp.lt.s32.totalorder %s611_s4, %s836_s3 }
  0x2f   : > { %313 = vmatpush.msrb.mxu0 %v499_v6  ;;  %288 = vmatpush.msra.mxu3 %v196_v7  ;;  %p613_p6 = scmp.ne.s32.totalorder %s611_s4, %s612_s6  ;;  %p618_p1 = scmp.lt.s32.totalorder %s616_s7, %s612_s6 }
  0x30   : > { %362 = vmatpush.msrb.mxu2 %v503_v8  ;;  %240 = vmatpush.msra.mxu1 %v196_v7 }
  0x31   : > { %314 = vmatpush.msrb.mxu0 %v498_v9  ;;  %289 = vmatpush.msra.mxu3 %v195_v10  ;;  %p614_p9 = pnand %p613_p6, %p738_p11  ;;  %p619_p3 = por %p618_p1, %p617_p0 }
  0x32   : > { %241 = vmatpush.msra.mxu1 %v195_v10 }
  0x33   : > { %384 = vmatpush.msrb.mxu3 %v196_v7  ;;  %p615_p13 = pneg %p614_p9 }
  0x34   : > { %336 = vmatpush.msrb.mxu1 %v196_v7 }
  0x35   : > { %505 = vmatmul.msk.f32.vlgmr.msrb.gmra.mxu2 %vm199_vm0, %v194_v2  ;;  %385 = vmatpush.msrb.mxu3 %v195_v10  ;;  %p620_p4 = pnand %p619_p3, %p615_p13 }
  0x36   : > { %500 = vmatmul.msk.f32.vlgmr.msrb.gmra.mxu0 %vm199_vm0, %v194_v2  ;;  %337 = vmatpush.msrb.mxu1 %v195_v10 }
  0xab   : > { %v220_v11 = vpop.f32.mrf.mxu0 }
  0xac   : > { %492 = vmatmul.msk.f32.vlgmr.msra.gmra.mxu1 %vm199_vm0, %v220_v11 }
  0xb0   : > { %v268_v12 = vpop.f32.mrf.mxu2 }
  0xb1   : > { %496 = vmatmul.msk.f32.vlgmr.msra.gmra.mxu3 %vm199_vm0, %v268_v12 }
  0xb3   : > { %v316_v13 = vpop.f32.mrf.mxu0 }
  0xb4   : > { %501 = vmatmul.msk.f32.vlgmr.msrb.gmra.mxu1 %vm199_vm0, %v316_v13 }
  0xb8   : > { %v364_v14 = vpop.f32.mrf.mxu2 }
  0xb9   : > { %506 = vmatmul.msk.f32.vlgmr.msrb.gmra.mxu3 %vm199_vm0, %v364_v14 }
 0x129   : > { %v243_v15 = vpop.f32.mrf.mxu1 }
 0x12a   : > { %247 = vst.msk [vmem:[%s191_s17] sm:$0xff] %vm246_vm1, %v243_v15 }
 0x131   : > { %v339_v16 = vpop.f32.mrf.mxu1 }
 0x132   : > { %502 = vst.msk [vmem:[%s191_s17 + $0x10] sm:$0xff] %vm246_vm1, %v339_v16 }
 0x134   : > { %v291_v17 = vpop.f32.mrf.mxu3 }
 0x135   : > { %497 = vst.msk [vmem:[%s191_s17 + $0x8] sm:$0xff] %vm246_vm1, %v291_v17 }
 0x13c   : > { %v387_v18 = vpop.f32.mrf.mxu3 }
 0x13d   : > { %507 = vst.msk [vmem:[%s191_s17 + $0x18] sm:$0xff] %vm246_vm1, %v387_v18 }
 0x13e   : > { %623 = shalt.err (!%p620_p4)
}
 0x13f   : > { %s666_s29 = smov 128   ;;  %s667_s23 = smov 8  }
 0x140   : > { %518 = dma.vmem_to_hbm [thread:$0]  (%p738_p11), %s406_s26, 512, %s408_s28, %s393_s30, %s666_s29, %s666_s29, %s667_s23  }
 0x141 PF: > { %s422_s10 = sand.u32 1, %s650_s12   ;;  %p842_p7 = scmp.ge.s32.totalorder %s662_s15, 2 }
 0x142   : > { %s423_s11 = scalar_lea.sflag [#allocation4], %s422_s10 }
 0x143   : > { %p525_p5 = pnand %p842_p7, %p742_p12 }
 0x145   : > { %p526_p8 = pneg %p525_p5 }
 0x147   : > { %645 = dma.done.wait (%p526_p8), %s423_s11, 512  }
 0x148   : > { %647 = vsyncadd (%p526_p8), %s423_s11, 4294966784  ;;  %p16_p10 = scmp.ge.s32.totalorder %s713_s18, 4   ;;  %s843_s12 = smov %s654_s13 }
 0x149   : > { %s844_s13 = smov %s658_s14  ;;  %s845_s14 = smov %s725_s21 }
 0x14a   : > { %s846_s15 = smov %s713_s18  ;;  %18 = sbr.rel (!%p16_p10) target bundleno = 5 (0x5), region = 83 }
 0x14f   :  { %429 = vsyncpa [#allocation3], 1 }
 0x150   :  { %431 = vsyncpa [#allocation3 + $0x1], 1 }
 0x151   :  { %432 = vsyncpa [#allocation4], 1 }
 0x152   :  { %434 = vsyncpa [#allocation4 + $0x1], 1 }

</bundles_post_ra>
